<compile_context>
chip_gen: v6e
topology: v6e:2x2x1
jax: 0.10.0
libtpu: 0.0.40
codegen_flags: <defaults>
</compile_context>

<pallas_src>
import functools
import math

import jax
import jax.numpy as jnp
from jax.experimental import pallas as pl
from jax.experimental.pallas import tpu as pltpu

NUM_LAYERS = 16
LEAKY_SLOPE = 0.01        # torch.nn.LeakyReLU default negative_slope
PAD_DIM = 128             # lane width of the packed weight slabs
MAX_TR = 512              # packed-row tile cap (keeps all intermediates << 16 MiB VMEM)


def _cdiv(a, b):
    return -(-a // b)


def _round_up(x, m):
    return _cdiv(x, m) * m


def _num_groups(dim_input, dim_hidden):
    """How many independent row-groups fit across the 128 lanes."""
    assert 1 <= dim_hidden <= PAD_DIM, "dim_hidden must fit in 128 lanes"
    assert 1 <= dim_input <= PAD_DIM, "dim_input must fit in 128 lanes"
    return max(1, min(PAD_DIM // dim_hidden, PAD_DIM // dim_input))


def _mlp_kernel(x_ref, w_ref, b_ref, o_ref):
    """x: (TR, G*Din) bf16 packed rows; w: (16, 128, 128) bf16 block-diagonal;
    b: (16, 128) f32 band-replicated biases; o: (TR, G) f32 (lane g = group g)."""
    win = x_ref.shape[-1]          # G * dim_input (static)
    g_out = o_ref.shape[-1]        # G (static)
    biases = b_ref[...]            # (16, 128) f32

    # Layer 1: contract only over the compact packed-input rows of W.
    acc = jnp.dot(x_ref[...], w_ref[0][:win, :],
                  preferred_element_type=jnp.float32) + biases[0:1, :]
    acc = jnp.maximum(acc, LEAKY_SLOPE * acc)          # LeakyReLU, f32
    h = acc.astype(jnp.bfloat16)

    # Hidden layers 2..15: uniform (TR,128) x (128,128) bf16 MXU passes.
    for l in range(1, NUM_LAYERS - 1):
        acc = jnp.dot(h, w_ref[l],
                      preferred_element_type=jnp.float32) + biases[l:l + 1, :]
        acc = jnp.maximum(acc, LEAKY_SLOPE * acc)
        h = acc.astype(jnp.bfloat16)                    # dropout = identity (eval)

    # linear_out: each group's scalar lands in lane g (columns 0..G-1 of W).
    acc = (jnp.dot(h, w_ref[NUM_LAYERS - 1],
                   preferred_element_type=jnp.float32)
           + biases[NUM_LAYERS - 1:NUM_LAYERS, :])
    o_ref[...] = acc[:, :g_out]


@functools.partial(jax.jit, static_argnames=("dim_hidden",))
def nn_multinomial_regression_forward(vX, w_stack, b_stack, *, dim_hidden):
    """vX: (..., dim_input) float32 -> (..., 1) float32."""
    lead = vX.shape[:-1]
    dim_input = vX.shape[-1]
    M = math.prod(lead) if lead else 1              # static python int
    D = w_stack.shape[-1]
    assert w_stack.shape == (NUM_LAYERS, PAD_DIM, PAD_DIM)
    assert b_stack.shape == (NUM_LAYERS, PAD_DIM)
    G = _num_groups(dim_input, dim_hidden)
    win = G * dim_input

    # Balanced packed-row tiling; force >=2 tiles when there is real work so
    # v7x's second TensorCore gets a "parallel" grid step.
    r_needed = max(1, _cdiv(M, G))                  # packed rows needed
    num_tiles = _cdiv(r_needed, MAX_TR)
    if num_tiles == 1 and r_needed > 8:
        num_tiles = 2
    tr = _round_up(_cdiv(r_needed, num_tiles), 8)
    rp = num_tiles * tr
    mp = rp * G

    # Compact, group-packed input: packed[r, g*Din + d] = x[g*rp + r, d].
    x2d = vX.reshape(M, dim_input).astype(jnp.bfloat16)
    x_pad = jnp.pad(x2d, ((0, mp - M), (0, 0)))
    x_packed = x_pad.reshape(G, rp, dim_input).transpose(1, 0, 2).reshape(rp, win)

    out_packed = pl.pallas_call(
        _mlp_kernel,
        out_shape=jax.ShapeDtypeStruct((rp, G), jnp.float32),
        grid_spec=pltpu.PrefetchScalarGridSpec(
            num_scalar_prefetch=0,
            grid=(rp // tr,),
            in_specs=[
                pl.BlockSpec((tr, win), lambda i: (i, 0)),
                # Constant index_map: the 512 KiB bf16 weight slab is DMA'd
                # once and not re-fetched across grid steps.
                pl.BlockSpec((NUM_LAYERS, D, D), lambda i: (0, 0, 0)),
                pl.BlockSpec((NUM_LAYERS, D), lambda i: (0, 0)),
            ],
            out_specs=pl.BlockSpec((tr, G), lambda i: (i, 0)),
        ),
        compiler_params=pltpu.CompilerParams(
            # Row tiles are independent -> shard across v7x's 2 TensorCores.
            dimension_semantics=("parallel",)),
    )(x_packed, w_stack, b_stack)

    # Unpack: original row m = g*rp + r lives at out_packed[r, g].
    out_flat = out_packed.T.reshape(mp)[:M]
    return out_flat.reshape(lead + (1,))


def init_params(key, dim_input, dim_hidden, pad_dim=PAD_DIM):
    """torch.nn.Linear-style init: U(-1/sqrt(fan_in), 1/sqrt(fan_in)).

    Returns the block-diagonal bf16 weight stack (16, D, D) [stored (in, out)],
    the band-replicated f32 bias stack (16, D), and the raw f32 per-layer
    weights/biases used by the references."""
    h = dim_hidden
    hh = dim_hidden // 2
    layer_dims = (
        [(dim_input, h)] + [(h, h)] * 4 + [(h, hh)] + [(hh, hh)] * 9 + [(hh, 1)]
    )
    assert len(layer_dims) == NUM_LAYERS
    G = _num_groups(dim_input, dim_hidden)
    D = pad_dim

    w_stack = jnp.zeros((NUM_LAYERS, D, D), jnp.float32)
    b_stack = jnp.zeros((NUM_LAYERS, D), jnp.float32)
    keys = jax.random.split(key, 2 * NUM_LAYERS)
    raw_ws, raw_bs = [], []
    for l, (fin, fout) in enumerate(layer_dims):
        bound = 1.0 / math.sqrt(fin)
        w = jax.random.uniform(keys[2 * l], (fin, fout), jnp.float32,
                               minval=-bound, maxval=bound)
        b = jax.random.uniform(keys[2 * l + 1], (fout,), jnp.float32,
                               minval=-bound, maxval=bound)
        raw_ws.append(w)
        raw_bs.append(b)
        row_stride = dim_input if l == 0 else dim_hidden
        for g in range(G):
            r0 = g * row_stride
            # Output layer packs group g's scalar into lane g; hidden layers
            # use 32-lane (dim_hidden) bands per group.
            c0 = g if l == NUM_LAYERS - 1 else g * dim_hidden
            w_stack = w_stack.at[l, r0:r0 + fin, c0:c0 + fout].set(w)
            b_stack = b_stack.at[l, c0:c0 + fout].set(b)
    return w_stack.astype(jnp.bfloat16), b_stack, raw_ws, raw_bs


def reference_forward_f32(vX, raw_ws, raw_bs):
    """Plain-JAX f32 reference of the PyTorch forward (eval mode)."""
    h = vX.astype(jnp.float32)
    for l, (w, b) in enumerate(zip(raw_ws, raw_bs)):
        h = h @ w + b
        if l < NUM_LAYERS - 1:
            h = jnp.where(h >= 0.0, h, LEAKY_SLOPE * h)
    return h


def reference_forward_bf16(vX, raw_ws, raw_bs):
    """Emulates the kernel numerics: bf16 weights/activations, f32 accumulate,
    f32 bias add, f32 LeakyReLU."""
    h = vX.astype(jnp.bfloat16)
    for l, (w, b) in enumerate(zip(raw_ws, raw_bs)):
        acc = jnp.dot(h, w.astype(jnp.bfloat16),
                      preferred_element_type=jnp.float32) + b
        if l < NUM_LAYERS - 1:
            acc = jnp.maximum(acc, LEAKY_SLOPE * acc)
            h = acc.astype(jnp.bfloat16)
        else:
            h = acc
    return h


if __name__ == "__main__":
    dim_input = 4
    dim_hidden = 32

    key = jax.random.PRNGKey(0)
    kp, kx1, kx2 = jax.random.split(key, 3)
    w_stack, b_stack, raw_ws, raw_bs = init_params(kp, dim_input, dim_hidden)

    # vX ~ (num_origins, num_destinations, dim_input), as produced by get_X_T.
    vX = jax.random.normal(kx1, (2, 8, dim_input), jnp.float32)
    out = nn_multinomial_regression_forward(vX, w_stack, b_stack,
                                            dim_hidden=dim_hidden)
    out = jax.block_until_ready(out)
    assert out.shape == (2, 8, 1), out.shape

    # Tight check against a reference using the same bf16/f32 arithmetic.
    ref_bf16 = reference_forward_bf16(vX, raw_ws, raw_bs)
    assert jnp.allclose(out, ref_bf16, atol=5e-3, rtol=5e-3), (
        float(jnp.max(jnp.abs(out - ref_bf16))))

    # Loose check against the exact f32 PyTorch-equivalent forward.
    ref_f32 = reference_forward_f32(vX, raw_ws, raw_bs)
    assert jnp.allclose(out, ref_f32, atol=5e-2, rtol=5e-2), (
        float(jnp.max(jnp.abs(out - ref_f32))))

    # Second shape exercising the multi-tile "parallel" grid path.
    vX2 = jax.random.normal(kx2, (2, 300, dim_input), jnp.float32)
    out2 = jax.block_until_ready(
        nn_multinomial_regression_forward(vX2, w_stack, b_stack,
                                          dim_hidden=dim_hidden))
    assert out2.shape == (2, 300, 1), out2.shape
    ref2 = reference_forward_bf16(vX2, raw_ws, raw_bs)
    assert jnp.allclose(out2, ref2, atol=5e-3, rtol=5e-3), (
        float(jnp.max(jnp.abs(out2 - ref2))))

    print("KERNEL_OK")
</pallas_src>

<mosaic_0001>
module attributes {stable_mosaic.version = 11 : i64} {
  func.func @_mlp_kernel(%arg0: i32, %arg1: memref<8x16xbf16, #tpu.memory_space<vmem>>, %arg2: memref<16x128x128xbf16, #tpu.memory_space<vmem>>, %arg3: memref<16x128xf32, #tpu.memory_space<vmem>>, %arg4: memref<8x4xf32, #tpu.memory_space<vmem>>) attributes {dimension_semantics = [#tpu.dimension_semantics<parallel>], iteration_bounds = array<i64: 1>, scalar_prefetch = 0 : i64, scratch_operands = 0 : i64, tpu.core_type = #tpu.core_type<tc>, window_params = [{transform_indices = @transform_0, window_bounds = array<i64: 8, 16>}, {pipeline_mode = #tpu.pipeline_mode<synchronous>, transform_indices = @transform_1, window_bounds = array<i64: 16, 128, 128>}, {pipeline_mode = #tpu.pipeline_mode<synchronous>, transform_indices = @transform_2, window_bounds = array<i64: 16, 128>}, {transform_indices = @transform_3, window_bounds = array<i64: 8, 4>}]} {
    %c0 = arith.constant 0 : index
    %c0_0 = arith.constant 0 : index
    %0 = vector.load %arg3[%c0, %c0_0] : memref<16x128xf32, #tpu.memory_space<vmem>>, vector<16x128xf32>
    %c0_1 = arith.constant 0 : index
    %c0_2 = arith.constant 0 : index
    %1 = vector.load %arg1[%c0_1, %c0_2] : memref<8x16xbf16, #tpu.memory_space<vmem>>, vector<8x16xbf16>
    %c0_3 = arith.constant 0 : index
    %c0_4 = arith.constant 0 : index
    %c0_5 = arith.constant 0 : index
    %2 = vector.load %arg2[%c0_3, %c0_4, %c0_5] : memref<16x128x128xbf16, #tpu.memory_space<vmem>>, vector<1x128x128xbf16>
    %3 = vector.shape_cast %2 : vector<1x128x128xbf16> to vector<128x128xbf16>
    %4 = vector.extract_strided_slice %3 {offsets = [0, 0], sizes = [16, 128], strides = [1, 1]} : vector<128x128xbf16> to vector<16x128xbf16>
    %cst = arith.constant dense<0.000000e+00> : vector<8x128xf32>
    %5 = tpu.matmul %1, %4, %cst {dimension_numbers = #tpu.dot_dimension_numbers<[1], [0], [0], [1], [0, 0, 1, 1], [], []>} : vector<8x16xbf16>, vector<16x128xbf16>, vector<8x128xf32> -> vector<8x128xf32>
    %6 = vector.extract_strided_slice %0 {offsets = [0, 0], sizes = [1, 128], strides = [1, 1]} : vector<16x128xf32> to vector<1x128xf32>
    %7 = vector.broadcast %6 : vector<1x128xf32> to vector<8x128xf32>
    %8 = arith.addf %5, %7 : vector<8x128xf32>
    %cst_6 = arith.constant 0.00999999977 : f32
    %9 = vector.broadcast %cst_6 : f32 to vector<8x128xf32>
    %10 = arith.mulf %9, %8 : vector<8x128xf32>
    %11 = arith.maximumf %8, %10 : vector<8x128xf32>
    %12 = arith.truncf %11 : vector<8x128xf32> to vector<8x128xbf16>
    %c1 = arith.constant 1 : index
    %c0_7 = arith.constant 0 : index
    %c0_8 = arith.constant 0 : index
    %13 = vector.load %arg2[%c1, %c0_7, %c0_8] : memref<16x128x128xbf16, #tpu.memory_space<vmem>>, vector<1x128x128xbf16>
    %14 = vector.shape_cast %13 : vector<1x128x128xbf16> to vector<128x128xbf16>
    %cst_9 = arith.constant dense<0.000000e+00> : vector<8x128xf32>
    %15 = tpu.matmul %12, %14, %cst_9 {dimension_numbers = #tpu.dot_dimension_numbers<[1], [0], [0], [1], [0, 0, 1, 1], [], []>} : vector<8x128xbf16>, vector<128x128xbf16>, vector<8x128xf32> -> vector<8x128xf32>
    %16 = vector.extract_strided_slice %0 {offsets = [1, 0], sizes = [1, 128], strides = [1, 1]} : vector<16x128xf32> to vector<1x128xf32>
    %17 = vector.broadcast %16 : vector<1x128xf32> to vector<8x128xf32>
    %18 = arith.addf %15, %17 : vector<8x128xf32>
    %cst_10 = arith.constant 0.00999999977 : f32
    %19 = vector.broadcast %cst_10 : f32 to vector<8x128xf32>
    %20 = arith.mulf %19, %18 : vector<8x128xf32>
    %21 = arith.maximumf %18, %20 : vector<8x128xf32>
    %22 = arith.truncf %21 : vector<8x128xf32> to vector<8x128xbf16>
    %c2 = arith.constant 2 : index
    %c0_11 = arith.constant 0 : index
    %c0_12 = arith.constant 0 : index
    %23 = vector.load %arg2[%c2, %c0_11, %c0_12] : memref<16x128x128xbf16, #tpu.memory_space<vmem>>, vector<1x128x128xbf16>
    %24 = vector.shape_cast %23 : vector<1x128x128xbf16> to vector<128x128xbf16>
    %cst_13 = arith.constant dense<0.000000e+00> : vector<8x128xf32>
    %25 = tpu.matmul %22, %24, %cst_13 {dimension_numbers = #tpu.dot_dimension_numbers<[1], [0], [0], [1], [0, 0, 1, 1], [], []>} : vector<8x128xbf16>, vector<128x128xbf16>, vector<8x128xf32> -> vector<8x128xf32>
    %26 = vector.extract_strided_slice %0 {offsets = [2, 0], sizes = [1, 128], strides = [1, 1]} : vector<16x128xf32> to vector<1x128xf32>
    %27 = vector.broadcast %26 : vector<1x128xf32> to vector<8x128xf32>
    %28 = arith.addf %25, %27 : vector<8x128xf32>
    %cst_14 = arith.constant 0.00999999977 : f32
    %29 = vector.broadcast %cst_14 : f32 to vector<8x128xf32>
    %30 = arith.mulf %29, %28 : vector<8x128xf32>
    %31 = arith.maximumf %28, %30 : vector<8x128xf32>
    %32 = arith.truncf %31 : vector<8x128xf32> to vector<8x128xbf16>
    %c3 = arith.constant 3 : index
    %c0_15 = arith.constant 0 : index
    %c0_16 = arith.constant 0 : index
    %33 = vector.load %arg2[%c3, %c0_15, %c0_16] : memref<16x128x128xbf16, #tpu.memory_space<vmem>>, vector<1x128x128xbf16>
    %34 = vector.shape_cast %33 : vector<1x128x128xbf16> to vector<128x128xbf16>
    %cst_17 = arith.constant dense<0.000000e+00> : vector<8x128xf32>
    %35 = tpu.matmul %32, %34, %cst_17 {dimension_numbers = #tpu.dot_dimension_numbers<[1], [0], [0], [1], [0, 0, 1, 1], [], []>} : vector<8x128xbf16>, vector<128x128xbf16>, vector<8x128xf32> -> vector<8x128xf32>
    %36 = vector.extract_strided_slice %0 {offsets = [3, 0], sizes = [1, 128], strides = [1, 1]} : vector<16x128xf32> to vector<1x128xf32>
    %37 = vector.broadcast %36 : vector<1x128xf32> to vector<8x128xf32>
    %38 = arith.addf %35, %37 : vector<8x128xf32>
    %cst_18 = arith.constant 0.00999999977 : f32
    %39 = vector.broadcast %cst_18 : f32 to vector<8x128xf32>
    %40 = arith.mulf %39, %38 : vector<8x128xf32>
    %41 = arith.maximumf %38, %40 : vector<8x128xf32>
    %42 = arith.truncf %41 : vector<8x128xf32> to vector<8x128xbf16>
    %c4 = arith.constant 4 : index
    %c0_19 = arith.constant 0 : index
    %c0_20 = arith.constant 0 : index
    %43 = vector.load %arg2[%c4, %c0_19, %c0_20] : memref<16x128x128xbf16, #tpu.memory_space<vmem>>, vector<1x128x128xbf16>
    %44 = vector.shape_cast %43 : vector<1x128x128xbf16> to vector<128x128xbf16>
    %cst_21 = arith.constant dense<0.000000e+00> : vector<8x128xf32>
    %45 = tpu.matmul %42, %44, %cst_21 {dimension_numbers = #tpu.dot_dimension_numbers<[1], [0], [0], [1], [0, 0, 1, 1], [], []>} : vector<8x128xbf16>, vector<128x128xbf16>, vector<8x128xf32> -> vector<8x128xf32>
    %46 = vector.extract_strided_slice %0 {offsets = [4, 0], sizes = [1, 128], strides = [1, 1]} : vector<16x128xf32> to vector<1x128xf32>
    %47 = vector.broadcast %46 : vector<1x128xf32> to vector<8x128xf32>
    %48 = arith.addf %45, %47 : vector<8x128xf32>
    %cst_22 = arith.constant 0.00999999977 : f32
    %49 = vector.broadcast %cst_22 : f32 to vector<8x128xf32>
    %50 = arith.mulf %49, %48 : vector<8x128xf32>
    %51 = arith.maximumf %48, %50 : vector<8x128xf32>
    %52 = arith.truncf %51 : vector<8x128xf32> to vector<8x128xbf16>
    %c5 = arith.constant 5 : index
    %c0_23 = arith.constant 0 : index
    %c0_24 = arith.constant 0 : index
    %53 = vector.load %arg2[%c5, %c0_23, %c0_24] : memref<16x128x128xbf16, #tpu.memory_space<vmem>>, vector<1x128x128xbf16>
    %54 = vector.shape_cast %53 : vector<1x128x128xbf16> to vector<128x128xbf16>
    %cst_25 = arith.constant dense<0.000000e+00> : vector<8x128xf32>
    %55 = tpu.matmul %52, %54, %cst_25 {dimension_numbers = #tpu.dot_dimension_numbers<[1], [0], [0], [1], [0, 0, 1, 1], [], []>} : vector<8x128xbf16>, vector<128x128xbf16>, vector<8x128xf32> -> vector<8x128xf32>
    %56 = vector.extract_strided_slice %0 {offsets = [5, 0], sizes = [1, 128], strides = [1, 1]} : vector<16x128xf32> to vector<1x128xf32>
    %57 = vector.broadcast %56 : vector<1x128xf32> to vector<8x128xf32>
    %58 = arith.addf %55, %57 : vector<8x128xf32>
    %cst_26 = arith.constant 0.00999999977 : f32
    %59 = vector.broadcast %cst_26 : f32 to vector<8x128xf32>
    %60 = arith.mulf %59, %58 : vector<8x128xf32>
    %61 = arith.maximumf %58, %60 : vector<8x128xf32>
    %62 = arith.truncf %61 : vector<8x128xf32> to vector<8x128xbf16>
    %c6 = arith.constant 6 : index
    %c0_27 = arith.constant 0 : index
    %c0_28 = arith.constant 0 : index
    %63 = vector.load %arg2[%c6, %c0_27, %c0_28] : memref<16x128x128xbf16, #tpu.memory_space<vmem>>, vector<1x128x128xbf16>
    %64 = vector.shape_cast %63 : vector<1x128x128xbf16> to vector<128x128xbf16>
    %cst_29 = arith.constant dense<0.000000e+00> : vector<8x128xf32>
    %65 = tpu.matmul %62, %64, %cst_29 {dimension_numbers = #tpu.dot_dimension_numbers<[1], [0], [0], [1], [0, 0, 1, 1], [], []>} : vector<8x128xbf16>, vector<128x128xbf16>, vector<8x128xf32> -> vector<8x128xf32>
    %66 = vector.extract_strided_slice %0 {offsets = [6, 0], sizes = [1, 128], strides = [1, 1]} : vector<16x128xf32> to vector<1x128xf32>
    %67 = vector.broadcast %66 : vector<1x128xf32> to vector<8x128xf32>
    %68 = arith.addf %65, %67 : vector<8x128xf32>
    %cst_30 = arith.constant 0.00999999977 : f32
    %69 = vector.broadcast %cst_30 : f32 to vector<8x128xf32>
    %70 = arith.mulf %69, %68 : vector<8x128xf32>
    %71 = arith.maximumf %68, %70 : vector<8x128xf32>
    %72 = arith.truncf %71 : vector<8x128xf32> to vector<8x128xbf16>
    %c7 = arith.constant 7 : index
    %c0_31 = arith.constant 0 : index
    %c0_32 = arith.constant 0 : index
    %73 = vector.load %arg2[%c7, %c0_31, %c0_32] : memref<16x128x128xbf16, #tpu.memory_space<vmem>>, vector<1x128x128xbf16>
    %74 = vector.shape_cast %73 : vector<1x128x128xbf16> to vector<128x128xbf16>
    %cst_33 = arith.constant dense<0.000000e+00> : vector<8x128xf32>
    %75 = tpu.matmul %72, %74, %cst_33 {dimension_numbers = #tpu.dot_dimension_numbers<[1], [0], [0], [1], [0, 0, 1, 1], [], []>} : vector<8x128xbf16>, vector<128x128xbf16>, vector<8x128xf32> -> vector<8x128xf32>
    %76 = vector.extract_strided_slice %0 {offsets = [7, 0], sizes = [1, 128], strides = [1, 1]} : vector<16x128xf32> to vector<1x128xf32>
    %77 = vector.broadcast %76 : vector<1x128xf32> to vector<8x128xf32>
    %78 = arith.addf %75, %77 : vector<8x128xf32>
    %cst_34 = arith.constant 0.00999999977 : f32
    %79 = vector.broadcast %cst_34 : f32 to vector<8x128xf32>
    %80 = arith.mulf %79, %78 : vector<8x128xf32>
    %81 = arith.maximumf %78, %80 : vector<8x128xf32>
    %82 = arith.truncf %81 : vector<8x128xf32> to vector<8x128xbf16>
    %c8 = arith.constant 8 : index
    %c0_35 = arith.constant 0 : index
    %c0_36 = arith.constant 0 : index
    %83 = vector.load %arg2[%c8, %c0_35, %c0_36] : memref<16x128x128xbf16, #tpu.memory_space<vmem>>, vector<1x128x128xbf16>
    %84 = vector.shape_cast %83 : vector<1x128x128xbf16> to vector<128x128xbf16>
    %cst_37 = arith.constant dense<0.000000e+00> : vector<8x128xf32>
    %85 = tpu.matmul %82, %84, %cst_37 {dimension_numbers = #tpu.dot_dimension_numbers<[1], [0], [0], [1], [0, 0, 1, 1], [], []>} : vector<8x128xbf16>, vector<128x128xbf16>, vector<8x128xf32> -> vector<8x128xf32>
    %86 = vector.extract_strided_slice %0 {offsets = [8, 0], sizes = [1, 128], strides = [1, 1]} : vector<16x128xf32> to vector<1x128xf32>
    %87 = vector.broadcast %86 : vector<1x128xf32> to vector<8x128xf32>
    %88 = arith.addf %85, %87 : vector<8x128xf32>
    %cst_38 = arith.constant 0.00999999977 : f32
    %89 = vector.broadcast %cst_38 : f32 to vector<8x128xf32>
    %90 = arith.mulf %89, %88 : vector<8x128xf32>
    %91 = arith.maximumf %88, %90 : vector<8x128xf32>
    %92 = arith.truncf %91 : vector<8x128xf32> to vector<8x128xbf16>
    %c9 = arith.constant 9 : index
    %c0_39 = arith.constant 0 : index
    %c0_40 = arith.constant 0 : index
    %93 = vector.load %arg2[%c9, %c0_39, %c0_40] : memref<16x128x128xbf16, #tpu.memory_space<vmem>>, vector<1x128x128xbf16>
    %94 = vector.shape_cast %93 : vector<1x128x128xbf16> to vector<128x128xbf16>
    %cst_41 = arith.constant dense<0.000000e+00> : vector<8x128xf32>
    %95 = tpu.matmul %92, %94, %cst_41 {dimension_numbers = #tpu.dot_dimension_numbers<[1], [0], [0], [1], [0, 0, 1, 1], [], []>} : vector<8x128xbf16>, vector<128x128xbf16>, vector<8x128xf32> -> vector<8x128xf32>
    %96 = vector.extract_strided_slice %0 {offsets = [9, 0], sizes = [1, 128], strides = [1, 1]} : vector<16x128xf32> to vector<1x128xf32>
    %97 = vector.broadcast %96 : vector<1x128xf32> to vector<8x128xf32>
    %98 = arith.addf %95, %97 : vector<8x128xf32>
    %cst_42 = arith.constant 0.00999999977 : f32
    %99 = vector.broadcast %cst_42 : f32 to vector<8x128xf32>
    %100 = arith.mulf %99, %98 : vector<8x128xf32>
    %101 = arith.maximumf %98, %100 : vector<8x128xf32>
    %102 = arith.truncf %101 : vector<8x128xf32> to vector<8x128xbf16>
    %c10 = arith.constant 10 : index
    %c0_43 = arith.constant 0 : index
    %c0_44 = arith.constant 0 : index
    %103 = vector.load %arg2[%c10, %c0_43, %c0_44] : memref<16x128x128xbf16, #tpu.memory_space<vmem>>, vector<1x128x128xbf16>
    %104 = vector.shape_cast %103 : vector<1x128x128xbf16> to vector<128x128xbf16>
    %cst_45 = arith.constant dense<0.000000e+00> : vector<8x128xf32>
    %105 = tpu.matmul %102, %104, %cst_45 {dimension_numbers = #tpu.dot_dimension_numbers<[1], [0], [0], [1], [0, 0, 1, 1], [], []>} : vector<8x128xbf16>, vector<128x128xbf16>, vector<8x128xf32> -> vector<8x128xf32>
    %106 = vector.extract_strided_slice %0 {offsets = [10, 0], sizes = [1, 128], strides = [1, 1]} : vector<16x128xf32> to vector<1x128xf32>
    %107 = vector.broadcast %106 : vector<1x128xf32> to vector<8x128xf32>
    %108 = arith.addf %105, %107 : vector<8x128xf32>
    %cst_46 = arith.constant 0.00999999977 : f32
    %109 = vector.broadcast %cst_46 : f32 to vector<8x128xf32>
    %110 = arith.mulf %109, %108 : vector<8x128xf32>
    %111 = arith.maximumf %108, %110 : vector<8x128xf32>
    %112 = arith.truncf %111 : vector<8x128xf32> to vector<8x128xbf16>
    %c11 = arith.constant 11 : index
    %c0_47 = arith.constant 0 : index
    %c0_48 = arith.constant 0 : index
    %113 = vector.load %arg2[%c11, %c0_47, %c0_48] : memref<16x128x128xbf16, #tpu.memory_space<vmem>>, vector<1x128x128xbf16>
    %114 = vector.shape_cast %113 : vector<1x128x128xbf16> to vector<128x128xbf16>
    %cst_49 = arith.constant dense<0.000000e+00> : vector<8x128xf32>
    %115 = tpu.matmul %112, %114, %cst_49 {dimension_numbers = #tpu.dot_dimension_numbers<[1], [0], [0], [1], [0, 0, 1, 1], [], []>} : vector<8x128xbf16>, vector<128x128xbf16>, vector<8x128xf32> -> vector<8x128xf32>
    %116 = vector.extract_strided_slice %0 {offsets = [11, 0], sizes = [1, 128], strides = [1, 1]} : vector<16x128xf32> to vector<1x128xf32>
    %117 = vector.broadcast %116 : vector<1x128xf32> to vector<8x128xf32>
    %118 = arith.addf %115, %117 : vector<8x128xf32>
    %cst_50 = arith.constant 0.00999999977 : f32
    %119 = vector.broadcast %cst_50 : f32 to vector<8x128xf32>
    %120 = arith.mulf %119, %118 : vector<8x128xf32>
    %121 = arith.maximumf %118, %120 : vector<8x128xf32>
    %122 = arith.truncf %121 : vector<8x128xf32> to vector<8x128xbf16>
    %c12 = arith.constant 12 : index
    %c0_51 = arith.constant 0 : index
    %c0_52 = arith.constant 0 : index
    %123 = vector.load %arg2[%c12, %c0_51, %c0_52] : memref<16x128x128xbf16, #tpu.memory_space<vmem>>, vector<1x128x128xbf16>
    %124 = vector.shape_cast %123 : vector<1x128x128xbf16> to vector<128x128xbf16>
    %cst_53 = arith.constant dense<0.000000e+00> : vector<8x128xf32>
    %125 = tpu.matmul %122, %124, %cst_53 {dimension_numbers = #tpu.dot_dimension_numbers<[1], [0], [0], [1], [0, 0, 1, 1], [], []>} : vector<8x128xbf16>, vector<128x128xbf16>, vector<8x128xf32> -> vector<8x128xf32>
    %126 = vector.extract_strided_slice %0 {offsets = [12, 0], sizes = [1, 128], strides = [1, 1]} : vector<16x128xf32> to vector<1x128xf32>
    %127 = vector.broadcast %126 : vector<1x128xf32> to vector<8x128xf32>
    %128 = arith.addf %125, %127 : vector<8x128xf32>
    %cst_54 = arith.constant 0.00999999977 : f32
    %129 = vector.broadcast %cst_54 : f32 to vector<8x128xf32>
    %130 = arith.mulf %129, %128 : vector<8x128xf32>
    %131 = arith.maximumf %128, %130 : vector<8x128xf32>
    %132 = arith.truncf %131 : vector<8x128xf32> to vector<8x128xbf16>
    %c13 = arith.constant 13 : index
    %c0_55 = arith.constant 0 : index
    %c0_56 = arith.constant 0 : index
    %133 = vector.load %arg2[%c13, %c0_55, %c0_56] : memref<16x128x128xbf16, #tpu.memory_space<vmem>>, vector<1x128x128xbf16>
    %134 = vector.shape_cast %133 : vector<1x128x128xbf16> to vector<128x128xbf16>
    %cst_57 = arith.constant dense<0.000000e+00> : vector<8x128xf32>
    %135 = tpu.matmul %132, %134, %cst_57 {dimension_numbers = #tpu.dot_dimension_numbers<[1], [0], [0], [1], [0, 0, 1, 1], [], []>} : vector<8x128xbf16>, vector<128x128xbf16>, vector<8x128xf32> -> vector<8x128xf32>
    %136 = vector.extract_strided_slice %0 {offsets = [13, 0], sizes = [1, 128], strides = [1, 1]} : vector<16x128xf32> to vector<1x128xf32>
    %137 = vector.broadcast %136 : vector<1x128xf32> to vector<8x128xf32>
    %138 = arith.addf %135, %137 : vector<8x128xf32>
    %cst_58 = arith.constant 0.00999999977 : f32
    %139 = vector.broadcast %cst_58 : f32 to vector<8x128xf32>
    %140 = arith.mulf %139, %138 : vector<8x128xf32>
    %141 = arith.maximumf %138, %140 : vector<8x128xf32>
    %142 = arith.truncf %141 : vector<8x128xf32> to vector<8x128xbf16>
    %c14 = arith.constant 14 : index
    %c0_59 = arith.constant 0 : index
    %c0_60 = arith.constant 0 : index
    %143 = vector.load %arg2[%c14, %c0_59, %c0_60] : memref<16x128x128xbf16, #tpu.memory_space<vmem>>, vector<1x128x128xbf16>
    %144 = vector.shape_cast %143 : vector<1x128x128xbf16> to vector<128x128xbf16>
    %cst_61 = arith.constant dense<0.000000e+00> : vector<8x128xf32>
    %145 = tpu.matmul %142, %144, %cst_61 {dimension_numbers = #tpu.dot_dimension_numbers<[1], [0], [0], [1], [0, 0, 1, 1], [], []>} : vector<8x128xbf16>, vector<128x128xbf16>, vector<8x128xf32> -> vector<8x128xf32>
    %146 = vector.extract_strided_slice %0 {offsets = [14, 0], sizes = [1, 128], strides = [1, 1]} : vector<16x128xf32> to vector<1x128xf32>
    %147 = vector.broadcast %146 : vector<1x128xf32> to vector<8x128xf32>
    %148 = arith.addf %145, %147 : vector<8x128xf32>
    %cst_62 = arith.constant 0.00999999977 : f32
    %149 = vector.broadcast %cst_62 : f32 to vector<8x128xf32>
    %150 = arith.mulf %149, %148 : vector<8x128xf32>
    %151 = arith.maximumf %148, %150 : vector<8x128xf32>
    %152 = arith.truncf %151 : vector<8x128xf32> to vector<8x128xbf16>
    %c15 = arith.constant 15 : index
    %c0_63 = arith.constant 0 : index
    %c0_64 = arith.constant 0 : index
    %153 = vector.load %arg2[%c15, %c0_63, %c0_64] : memref<16x128x128xbf16, #tpu.memory_space<vmem>>, vector<1x128x128xbf16>
    %154 = vector.shape_cast %153 : vector<1x128x128xbf16> to vector<128x128xbf16>
    %cst_65 = arith.constant dense<0.000000e+00> : vector<8x128xf32>
    %155 = tpu.matmul %152, %154, %cst_65 {dimension_numbers = #tpu.dot_dimension_numbers<[1], [0], [0], [1], [0, 0, 1, 1], [], []>} : vector<8x128xbf16>, vector<128x128xbf16>, vector<8x128xf32> -> vector<8x128xf32>
    %156 = vector.extract_strided_slice %0 {offsets = [15, 0], sizes = [1, 128], strides = [1, 1]} : vector<16x128xf32> to vector<1x128xf32>
    %157 = vector.broadcast %156 : vector<1x128xf32> to vector<8x128xf32>
    %158 = arith.addf %155, %157 : vector<8x128xf32>
    %159 = vector.extract_strided_slice %158 {offsets = [0, 0], sizes = [8, 4], strides = [1, 1]} : vector<8x128xf32> to vector<8x4xf32>
    %c0_66 = arith.constant 0 : index
    %c0_67 = arith.constant 0 : index
    %160 = vector.load %arg4[%c0_66, %c0_67] : memref<8x4xf32, #tpu.memory_space<vmem>>, vector<8x4xf32>
    tpu.vector_store %arg4[%c0_66, %c0_67], %159 {strides = array<i32>} : memref<8x4xf32, #tpu.memory_space<vmem>>, vector<8x4xf32>,
    return
  }
  func.func @transform_0(%arg0: i32) -> (i32, i32) {
    %c0_i32 = arith.constant 0 : i32
    %c0_i32_0 = arith.constant 0 : i32
    return %arg0, %c0_i32 : i32, i32
  }
  func.func @transform_1(%arg0: i32) -> (i32, i32, i32) {
    %c0_i32 = arith.constant 0 : i32
    %c0_i32_0 = arith.constant 0 : i32
    %c0_i32_1 = arith.constant 0 : i32
    %c0_i32_2 = arith.constant 0 : i32
    return %c0_i32, %c0_i32_0, %c0_i32_1 : i32, i32, i32
  }
  func.func @transform_2(%arg0: i32) -> (i32, i32) {
    %c0_i32 = arith.constant 0 : i32
    %c0_i32_0 = arith.constant 0 : i32
    %c0_i32_1 = arith.constant 0 : i32
    return %c0_i32, %c0_i32_0 : i32, i32
  }
  func.func @transform_3(%arg0: i32) -> (i32, i32) {
    %c0_i32 = arith.constant 0 : i32
    %c0_i32_0 = arith.constant 0 : i32
    return %arg0, %c0_i32 : i32, i32
  }
}

</mosaic_0001>

<bundles_post_ra>
// kernel: nn_multinomial_regression_forward.1
= control target key start
LH: loop header
LB: loop body
LE: loop exit
PB: predicated region body
PF: predicated region fallthrough
CT: control target
= control target key end

     0   :  { %8 = vsyncpa [#allocation3], 0  ;;  %s2488_s12 = smov [#allocation2]   ;;  %s2743_s0 = inlined_call_operand.vmem [shape: bf16[8,16], index: 0, kind: input, shape index: {}]   ;;  %s2744_s1 = inlined_call_operand.hbm [shape: bf16[16,128,128], index: 1, kind: input, shape index: {}]   ;;  %s2745_s2 = inlined_call_operand.vmem [shape: f32[16,128], index: 2, kind: input, shape index: {}]   ;;  %s2746_s3 = inlined_call_operand.vmem [shape: f32[8,4], index: 3, kind: output, shape index: {}]  }
   0x1   :  { %s16_s13 = sshll.u32 %s2488_s12, 4  ;;  %s17_s13 = int_to_ptr.vmem [resolvable:$true] %s16_s13 }
   0x2   :  { %s2474_s14 = scalar_lea.vmem %s17_s13, 16384  ;;  %p2479_p1 = scmp.lt.s32.totalorder %s17_s13, %s17_s13 }
   0x3   :  { %p2475_p0 = scmp.ne.s32.totalorder %s17_s13, %s2474_s14  ;;  %p2480_p2 = scmp.lt.s32.totalorder %s2474_s14, %s2474_s14 }
   0x5   :  { %p2481_p3 = por %p2480_p2, %p2479_p1 }
   0x7   :  { %p2482_p4 = pnand %p2481_p3, %p2475_p0 }
   0x9   :  { %2485 = shalt.err (!%p2482_p4)
}
   0xa   :  { %s2489_s15 = smov 64   ;;  %s2490_s16 = smov 4  }
   0xb   :  { %22 = dma.hbm_to_vmem [thread:$0]  %s2744_s1, 16384, %s17_s13, [#allocation3], %s2489_s15, %s2489_s15, %s2490_s16  }
   0xc   :  { %2486 = dma.done.wait [#allocation3], 16384  }
   0xd   :  { %2487 = vsyncadd [#allocation3], 4294950912  ;;  %v2491_v0 = vmov 0.0   ;;  %vm2492_vm0 = vmmov 0   ;;  %v2345_v1 = vld [vmem:[#allocation2] sm:$0xff]   ;;  %vm44_vm1 = vcmask 130048   ;;  %v34_v17 = vlaneseq }
   0xe   :  { %2034 = vmatprep.subr.bf16.mxu0 %v2491_v0  ;;  %2036 = vmatprep.mubr.msk.bf16.mxu0 %vm2492_vm0, %v2491_v0  ;;  %v31_v2 = vld [vmem:[%s2743_s0] sm:$0xf]  ;;  %v2346_v3 = vld [vmem:[#allocation2 + $0x78] sm:$0xff]   ;;  %v2347_v4 = vld [vmem:[#allocation2 + $0x70] sm:$0xff]   ;;  %vm1768_vm2 = vcmask 31744  }
   0xf   :  { %2040 = vmatprep.subr.bf16.mxu1 %v2491_v0  ;;  %2056 = vmatprep.mubr.msk.bf16.mxu1 %vm2492_vm0, %v2491_v0  ;;  %v2348_v5 = vld [vmem:[#allocation2 + $0x68] sm:$0xff]   ;;  %v2349_v6 = vld [vmem:[#allocation2 + $0x60] sm:$0xff]   ;;  %v2350_v7 = vld [vmem:[#allocation2 + $0x58] sm:$0xff]   ;;  %v2542_v18 = vshrl.u32 %v34_v17, 7 }
  0x10   :  { %2035 = vmatpush3.bf16.msra.mxu0 %v2345_v1  ;;  %2041 = vmatpush3.bf16.msra.mxu1 %v2346_v3  ;;  %v2351_v8 = vld [vmem:[#allocation2 + $0x50] sm:$0xff]   ;;  %v2352_v9 = vld [vmem:[#allocation2 + $0x48] sm:$0xff]   ;;  %v2353_v10 = vld [vmem:[#allocation2 + $0x40] sm:$0xff]  }
  0x11   :  { %2060 = vmatprep.subr.bf16.mxu0 %v2491_v0  ;;  %2042 = vmatprep.subr.bf16.mxu1 %v2491_v0  ;;  %v2354_v11 = vld [vmem:[#allocation2 + $0xb8] sm:$0xff]   ;;  %v2355_v12 = vld [vmem:[#allocation2 + $0xb0] sm:$0xff]   ;;  %v2356_v13 = vld [vmem:[#allocation2 + $0xa8] sm:$0xff]   ;;  %v36_v19 = vsub.s32 0, %v2542_v18  ;;  %v110_v38 = vsub.s32 1, %v2542_v18  ;;  %v222_v56 = vsub.s32 2, %v2542_v18 }
  0x12   :  { %v2357_v14 = vld [vmem:[#allocation2 + $0xa0] sm:$0xff]   ;;  %v2358_v15 = vld [vmem:[#allocation2 + $0x98] sm:$0xff]   ;;  %v2359_v16 = vld [vmem:[#allocation2 + $0x90] sm:$0xff]  }
  0x13   :  { %2037 = vmatmul.mubr.msk.bf16.vlgmr.msra.gmra.mxu0 %vm44_vm1, %v31_v2  ;;  %v2548_v20 = vld [vmem:[%s2745_s2] sm:$0xff]  ;;  %v2360_v30 = vld [vmem:[#allocation2 + $0x88] sm:$0xff]   ;;  %v2362_v32 = vld [vmem:[#allocation2 + $0xf8] sm:$0xff]  }
  0x14   :  { %2076 = vmatprep.mubr.msk.bf16.mxu0 %vm2492_vm0, %v2491_v0  ;;  %2043 = vmatpush3.bf16.msra.mxu1 %v2347_v4  ;;  %v37_v21 = vrot.slane %v2548_v20, %v36_v19  ;;  %v2361_v31 = vld [vmem:[#allocation2 + $0x80] sm:$0xff]   ;;  %v2363_v33 = vld [vmem:[#allocation2 + $0xf0] sm:$0xff]   ;;  %v2364_v34 = vld [vmem:[#allocation2 + $0xe8] sm:$0xff]   ;;  %v111_v39 = vrot.slane %v2548_v20, %v110_v38  ;;  %v223_v57 = vrot.slane %v2548_v20, %v222_v56 }
  0x15   :  { %2044 = vmatprep.subr.bf16.mxu1 %v2491_v0  ;;  %2061 = vmatpush3.bf16.msra.mxu0 %v2354_v11  ;;  %v2365_v35 = vld [vmem:[#allocation2 + $0xe0] sm:$0xff]   ;;  %v2366_v36 = vld [vmem:[#allocation2 + $0xd8] sm:$0xff]   ;;  %v2367_v37 = vld [vmem:[#allocation2 + $0xd0] sm:$0xff]   ;;  %v334_v11 = vsub.s32 3, %v2542_v18 }
  0x16   :  { %2062 = vmatprep.subr.bf16.mxu0 %v2491_v0  ;;  %v2368_v48 = vld [vmem:[#allocation2 + $0xc8] sm:$0xff]   ;;  %v2369_v49 = vld [vmem:[#allocation2 + $0xc0] sm:$0xff]   ;;  %v2370_v50 = vld [vmem:[#allocation2 + $0x138] sm:$0xff]  }
  0x17   :  { %v2371_v51 = vld [vmem:[#allocation2 + $0x130] sm:$0xff]   ;;  %v2372_v52 = vld [vmem:[#allocation2 + $0x128] sm:$0xff]   ;;  %v2373_v53 = vld [vmem:[#allocation2 + $0x120] sm:$0xff]  }
  0x18   :  { %2045 = vmatpush3.bf16.msra.mxu1 %v2348_v5  ;;  %v2374_v54 = vld [vmem:[#allocation2 + $0x118] sm:$0xff]   ;;  %v2375_v55 = vld [vmem:[#allocation2 + $0x110] sm:$0xff]   ;;  %v2376_v3 = vld [vmem:[#allocation2 + $0x108] sm:$0xff]  }
  0x19   :  { %2046 = vmatprep.subr.bf16.mxu1 %v2491_v0  ;;  %2063 = vmatpush3.bf16.msra.mxu0 %v2355_v12  ;;  %v2377_v4 = vld [vmem:[#allocation2 + $0x100] sm:$0xff]   ;;  %v2378_v5 = vld [vmem:[#allocation2 + $0x178] sm:$0xff]   ;;  %v335_v12 = vrot.slane %v2548_v20, %v334_v11 }
  0x1a   :  { %2064 = vmatprep.subr.bf16.mxu0 %v2491_v0 }
  0x1c   :  { %2047 = vmatpush3.bf16.msra.mxu1 %v2349_v6  ;;  %v2379_v6 = vld [vmem:[#allocation2 + $0x170] sm:$0xff]  }
  0x1d   :  { %2048 = vmatprep.subr.bf16.mxu1 %v2491_v0  ;;  %2065 = vmatpush3.bf16.msra.mxu0 %v2356_v13 }
  0x1e   :  { %2066 = vmatprep.subr.bf16.mxu0 %v2491_v0 }
  0x20   :  { %2049 = vmatpush3.bf16.msra.mxu1 %v2350_v7  ;;  %v2380_v7 = vld [vmem:[#allocation2 + $0x168] sm:$0xff]  }
  0x21   :  { %2050 = vmatprep.subr.bf16.mxu1 %v2491_v0  ;;  %2067 = vmatpush3.bf16.msra.mxu0 %v2357_v14 }
  0x22   :  { %2068 = vmatprep.subr.bf16.mxu0 %v2491_v0 }
  0x24   :  { %2051 = vmatpush3.bf16.msra.mxu1 %v2351_v8  ;;  %v2381_v8 = vld [vmem:[#allocation2 + $0x160] sm:$0xff]  }
  0x25   :  { %2052 = vmatprep.subr.bf16.mxu1 %v2491_v0  ;;  %2069 = vmatpush3.bf16.msra.mxu0 %v2358_v15 }
  0x26   :  { %2070 = vmatprep.subr.bf16.mxu0 %v2491_v0 }
  0x28   :  { %2053 = vmatpush3.bf16.msra.mxu1 %v2352_v9  ;;  %v2382_v9 = vld [vmem:[#allocation2 + $0x158] sm:$0xff]  }
  0x29   :  { %2054 = vmatprep.subr.bf16.mxu1 %v2491_v0  ;;  %2071 = vmatpush3.bf16.msra.mxu0 %v2359_v16 }
  0x2a   :  { %2072 = vmatprep.subr.bf16.mxu0 %v2491_v0 }
  0x2c   :  { %2055 = vmatpush3.bf16.msra.mxu1 %v2353_v10  ;;  %v2383_v10 = vld [vmem:[#allocation2 + $0x150] sm:$0xff]  }
  0x2d   :  { %2080 = vmatprep.subr.bf16.mxu1 %v2491_v0  ;;  %2073 = vmatpush3.bf16.msra.mxu0 %v2360_v30  ;;  %v2390_v30 = vld [vmem:[#allocation2 + $0x198] sm:$0xff]  }
  0x2e   :  { %2074 = vmatprep.subr.bf16.mxu0 %v2491_v0 }
  0x31   :  { %2075 = vmatpush3.bf16.msra.mxu0 %v2361_v31  ;;  %v2391_v31 = vld [vmem:[#allocation2 + $0x190] sm:$0xff]  }
  0x32   :  { %2100 = vmatprep.subr.bf16.mxu0 %v2491_v0 }
  0xd3   :  { %v82_v22 = vpop.f32.mrf.mxu0 }
  0xd4   :  { %v83_v23 = vadd.f32 %v82_v22, %v37_v21 }
  0xd5   :  { %v2038_v24 = vpop.f32.mrf.mxu0 }
  0xd6   :  { %v88_v25 = vmul.f32 0.01, %v83_v23  ;;  %v2384_v24 = vld [vmem:[#allocation2 + $0x148] sm:$0xff]  }
  0xd7   :  { %v85_v26 = vpop.f32.mrf.mxu0 }
  0xd8   :  { %v89_v27 = vmax.f32 %v83_v23, %v88_v25  ;;  %v2385_v25 = vld [vmem:[#allocation2 + $0x140] sm:$0xff]   ;;  %v2386_v26 = vld [vmem:[#allocation2 + $0x1b8] sm:$0xff]  }
  0xd9   :  { %v2039_v28 = vpop.f32.mrf.mxu0 }
  0xda   :  { %v90_v29 = vpack.c.bf16 %v89_v27, %v89_v27  ;;  %v2387_v27 = vld [vmem:[#allocation2 + $0x1b0] sm:$0xff]   ;;  %v2388_v28 = vld [vmem:[#allocation2 + $0x1a8] sm:$0xff]  }
  0xdc   :  { %2057 = vmatmul.mubr.bf16.vlgmr.msra.gmra.mxu1 %v90_v29  ;;  %v2389_v29 = vld [vmem:[#allocation2 + $0x1a0] sm:$0xff]  }
  0xdd   :  { %2096 = vmatprep.mubr.msk.bf16.mxu1 %vm2492_vm0, %v2491_v0  ;;  %2081 = vmatpush3.bf16.msra.mxu1 %v2362_v32  ;;  %v446_v32 = vsub.s32 4, %v2542_v18 }
  0xde   :  { %2082 = vmatprep.subr.bf16.mxu1 %v2491_v0 }
  0xe1   :  { %2083 = vmatpush3.bf16.msra.mxu1 %v2363_v33  ;;  %v447_v33 = vrot.slane %v2548_v20, %v446_v32 }
  0xe2   :  { %2084 = vmatprep.subr.bf16.mxu1 %v2491_v0 }
  0xe5   :  { %2085 = vmatpush3.bf16.msra.mxu1 %v2364_v34 }
  0xe6   :  { %2086 = vmatprep.subr.bf16.mxu1 %v2491_v0 }
  0xe9   :  { %2087 = vmatpush3.bf16.msra.mxu1 %v2365_v35 }
  0xea   :  { %2088 = vmatprep.subr.bf16.mxu1 %v2491_v0 }
  0xed   :  { %2089 = vmatpush3.bf16.msra.mxu1 %v2366_v36 }
  0xee   :  { %2090 = vmatprep.subr.bf16.mxu1 %v2491_v0 }
  0xf1   :  { %2091 = vmatpush3.bf16.msra.mxu1 %v2367_v37 }
  0xf2   :  { %2092 = vmatprep.subr.bf16.mxu1 %v2491_v0 }
  0xf5   :  { %2093 = vmatpush3.bf16.msra.mxu1 %v2368_v48  ;;  %v2397_v48 = vld [vmem:[#allocation2 + $0x1e0] sm:$0xff]  }
  0xf6   :  { %2094 = vmatprep.subr.bf16.mxu1 %v2491_v0 }
  0xf9   :  { %2095 = vmatpush3.bf16.msra.mxu1 %v2369_v49  ;;  %v2398_v49 = vld [vmem:[#allocation2 + $0x1d8] sm:$0xff]  }
  0xfa   :  { %2120 = vmatprep.subr.bf16.mxu1 %v2491_v0 }
 0x19c   :  { %v194_v40 = vpop.f32.mrf.mxu1 }
 0x19d   :  { %v195_v41 = vadd.f32 %v194_v40, %v111_v39 }
 0x19e   :  { %v2058_v42 = vpop.f32.mrf.mxu1 }
 0x19f   :  { %v200_v43 = vmul.f32 0.01, %v195_v41 }
 0x1a0   :  { %v197_v44 = vpop.f32.mrf.mxu1 }
 0x1a1   :  { %v201_v45 = vmax.f32 %v195_v41, %v200_v43  ;;  %v2392_v43 = vld [vmem:[#allocation2 + $0x188] sm:$0xff]   ;;  %v2393_v44 = vld [vmem:[#allocation2 + $0x180] sm:$0xff]  }
 0x1a2   :  { %v2059_v46 = vpop.f32.mrf.mxu1 }
 0x1a3   :  { %v202_v47 = vpack.c.bf16 %v201_v45, %v201_v45  ;;  %v2394_v45 = vld [vmem:[#allocation2 + $0x1f8] sm:$0xff]   ;;  %v2395_v46 = vld [vmem:[#allocation2 + $0x1f0] sm:$0xff]  }
 0x1a5   :  { %2077 = vmatmul.mubr.bf16.vlgmr.msra.gmra.mxu0 %v202_v47  ;;  %v2396_v47 = vld [vmem:[#allocation2 + $0x1e8] sm:$0xff]  }
 0x1a6   :  { %2116 = vmatprep.mubr.msk.bf16.mxu0 %vm2492_vm0, %v2491_v0  ;;  %2101 = vmatpush3.bf16.msra.mxu0 %v2370_v50  ;;  %v2399_v50 = vld [vmem:[#allocation2 + $0x1d0] sm:$0xff]  }
 0x1a7   :  { %2102 = vmatprep.subr.bf16.mxu0 %v2491_v0 }
 0x1aa   :  { %2103 = vmatpush3.bf16.msra.mxu0 %v2371_v51  ;;  %v558_v51 = vsub.s32 5, %v2542_v18 }
 0x1ab   :  { %2104 = vmatprep.subr.bf16.mxu0 %v2491_v0 }
 0x1ae   :  { %2105 = vmatpush3.bf16.msra.mxu0 %v2372_v52  ;;  %v559_v52 = vrot.slane %v2548_v20, %v558_v51 }
 0x1af   :  { %2106 = vmatprep.subr.bf16.mxu0 %v2491_v0 }
 0x1b2   :  { %2107 = vmatpush3.bf16.msra.mxu0 %v2373_v53 }
 0x1b3   :  { %2108 = vmatprep.subr.bf16.mxu0 %v2491_v0 }
 0x1b6   :  { %2109 = vmatpush3.bf16.msra.mxu0 %v2374_v54 }
 0x1b7   :  { %2110 = vmatprep.subr.bf16.mxu0 %v2491_v0 }
 0x1ba   :  { %2111 = vmatpush3.bf16.msra.mxu0 %v2375_v55 }
 0x1bb   :  { %2112 = vmatprep.subr.bf16.mxu0 %v2491_v0 }
 0x1be   :  { %2113 = vmatpush3.bf16.msra.mxu0 %v2376_v3  ;;  %v2404_v3 = vld [vmem:[#allocation2 + $0x228] sm:$0xff]  }
 0x1bf   :  { %2114 = vmatprep.subr.bf16.mxu0 %v2491_v0 }
 0x1c2   :  { %2115 = vmatpush3.bf16.msra.mxu0 %v2377_v4  ;;  %v2405_v4 = vld [vmem:[#allocation2 + $0x220] sm:$0xff]  }
 0x1c3   :  { %2140 = vmatprep.subr.bf16.mxu0 %v2491_v0 }
 0x265   :  { %v306_v58 = vpop.f32.mrf.mxu0 }
 0x266   :  { %v307_v59 = vadd.f32 %v306_v58, %v223_v57 }
 0x267   :  { %v2078_v60 = vpop.f32.mrf.mxu0 }
 0x268   :  { %v312_v61 = vmul.f32 0.01, %v307_v59 }
 0x269   :  { %v309_v62 = vpop.f32.mrf.mxu0 }
 0x26a   :  { %v313_v63 = vmax.f32 %v307_v59, %v312_v61  ;;  %v2400_v62 = vld [vmem:[#allocation2 + $0x1c8] sm:$0xff]  }
 0x26b   :  { %v2079_v1 = vpop.f32.mrf.mxu0 }
 0x26c   :  { %v314_v2 = vpack.c.bf16 %v313_v63, %v313_v63  ;;  %v2401_v63 = vld [vmem:[#allocation2 + $0x1c0] sm:$0xff]   ;;  %v2402_v1 = vld [vmem:[#allocation2 + $0x238] sm:$0xff]  }
 0x26e   :  { %2097 = vmatmul.mubr.bf16.vlgmr.msra.gmra.mxu1 %v314_v2  ;;  %v2403_v2 = vld [vmem:[#allocation2 + $0x230] sm:$0xff]  }
 0x26f   :  { %2136 = vmatprep.mubr.msk.bf16.mxu1 %vm2492_vm0, %v2491_v0  ;;  %2121 = vmatpush3.bf16.msra.mxu1 %v2378_v5  ;;  %v2406_v5 = vld [vmem:[#allocation2 + $0x218] sm:$0xff]  }
 0x270   :  { %2122 = vmatprep.subr.bf16.mxu1 %v2491_v0 }
 0x273   :  { %2123 = vmatpush3.bf16.msra.mxu1 %v2379_v6  ;;  %v2407_v6 = vld [vmem:[#allocation2 + $0x210] sm:$0xff]  }
 0x274   :  { %2124 = vmatprep.subr.bf16.mxu1 %v2491_v0 }
 0x277   :  { %2125 = vmatpush3.bf16.msra.mxu1 %v2380_v7  ;;  %v670_v7 = vsub.s32 6, %v2542_v18 }
 0x278   :  { %2126 = vmatprep.subr.bf16.mxu1 %v2491_v0 }
 0x27b   :  { %2127 = vmatpush3.bf16.msra.mxu1 %v2381_v8  ;;  %v671_v8 = vrot.slane %v2548_v20, %v670_v7 }
 0x27c   :  { %2128 = vmatprep.subr.bf16.mxu1 %v2491_v0 }
 0x27f   :  { %2129 = vmatpush3.bf16.msra.mxu1 %v2382_v9 }
 0x280   :  { %2130 = vmatprep.subr.bf16.mxu1 %v2491_v0 }
 0x283   :  { %2131 = vmatpush3.bf16.msra.mxu1 %v2383_v10 }
 0x284   :  { %2132 = vmatprep.subr.bf16.mxu1 %v2491_v0 }
 0x287   :  { %2133 = vmatpush3.bf16.msra.mxu1 %v2384_v24  ;;  %v2411_v24 = vld [vmem:[#allocation2 + $0x270] sm:$0xff]  }
 0x288   :  { %2134 = vmatprep.subr.bf16.mxu1 %v2491_v0 }
 0x28b   :  { %2135 = vmatpush3.bf16.msra.mxu1 %v2385_v25  ;;  %v2412_v25 = vld [vmem:[#allocation2 + $0x268] sm:$0xff]  }
 0x28c   :  { %2160 = vmatprep.subr.bf16.mxu1 %v2491_v0 }
 0x32e   :  { %v418_v13 = vpop.f32.mrf.mxu1 }
 0x32f   :  { %v419_v14 = vadd.f32 %v418_v13, %v335_v12 }
 0x330   :  { %v2098_v15 = vpop.f32.mrf.mxu1 }
 0x331   :  { %v424_v16 = vmul.f32 0.01, %v419_v14 }
 0x332   :  { %v421_v17 = vpop.f32.mrf.mxu1 }
 0x333   :  { %v425_v21 = vmax.f32 %v419_v14, %v424_v16 }
 0x334   :  { %v2099_v22 = vpop.f32.mrf.mxu1 }
 0x335   :  { %v426_v23 = vpack.c.bf16 %v425_v21, %v425_v21  ;;  %v2408_v21 = vld [vmem:[#allocation2 + $0x208] sm:$0xff]   ;;  %v2409_v22 = vld [vmem:[#allocation2 + $0x200] sm:$0xff]  }
 0x337   :  { %2117 = vmatmul.mubr.bf16.vlgmr.msra.gmra.mxu0 %v426_v23  ;;  %v2410_v23 = vld [vmem:[#allocation2 + $0x278] sm:$0xff]  }
 0x338   :  { %2156 = vmatprep.mubr.msk.bf16.mxu0 %vm2492_vm0, %v2491_v0  ;;  %2141 = vmatpush3.bf16.msra.mxu0 %v2386_v26  ;;  %v2413_v26 = vld [vmem:[#allocation2 + $0x260] sm:$0xff]  }
 0x339   :  { %2142 = vmatprep.subr.bf16.mxu0 %v2491_v0 }
 0x33c   :  { %2143 = vmatpush3.bf16.msra.mxu0 %v2387_v27  ;;  %v2414_v27 = vld [vmem:[#allocation2 + $0x258] sm:$0xff]  }
 0x33d   :  { %2144 = vmatprep.subr.bf16.mxu0 %v2491_v0 }
 0x340   :  { %2145 = vmatpush3.bf16.msra.mxu0 %v2388_v28  ;;  %v2415_v28 = vld [vmem:[#allocation2 + $0x250] sm:$0xff]  }
 0x341   :  { %2146 = vmatprep.subr.bf16.mxu0 %v2491_v0 }
 0x344   :  { %2147 = vmatpush3.bf16.msra.mxu0 %v2389_v29  ;;  %v782_v29 = vsub.s32 7, %v2542_v18 }
 0x345   :  { %2148 = vmatprep.subr.bf16.mxu0 %v2491_v0 }
 0x348   :  { %2149 = vmatpush3.bf16.msra.mxu0 %v2390_v30  ;;  %v783_v30 = vrot.slane %v2548_v20, %v782_v29  ;;  %v2418_v20 = vld [vmem:[#allocation2 + $0x2b8] sm:$0xff]  }
 0x349   :  { %2150 = vmatprep.subr.bf16.mxu0 %v2491_v0 }
 0x34c   :  { %2151 = vmatpush3.bf16.msra.mxu0 %v2391_v31 }
 0x34d   :  { %2152 = vmatprep.subr.bf16.mxu0 %v2491_v0 }
 0x350   :  { %2153 = vmatpush3.bf16.msra.mxu0 %v2392_v43  ;;  %v2419_v43 = vld [vmem:[#allocation2 + $0x2b0] sm:$0xff]  }
 0x351   :  { %2154 = vmatprep.subr.bf16.mxu0 %v2491_v0 }
 0x354   :  { %2155 = vmatpush3.bf16.msra.mxu0 %v2393_v44  ;;  %v2420_v44 = vld [vmem:[#allocation2 + $0x2a8] sm:$0xff]  }
 0x355   :  { %2180 = vmatprep.subr.bf16.mxu0 %v2491_v0 }
 0x3f7   :  { %v530_v34 = vpop.f32.mrf.mxu0 }
 0x3f8   :  { %v531_v35 = vadd.f32 %v530_v34, %v447_v33 }
 0x3f9   :  { %v2118_v36 = vpop.f32.mrf.mxu0 }
 0x3fa   :  { %v536_v37 = vmul.f32 0.01, %v531_v35 }
 0x3fb   :  { %v533_v39 = vpop.f32.mrf.mxu0 }
 0x3fc   :  { %v537_v40 = vmax.f32 %v531_v35, %v536_v37 }
 0x3fd   :  { %v2119_v41 = vpop.f32.mrf.mxu0 }
 0x3fe   :  { %v538_v42 = vpack.c.bf16 %v537_v40, %v537_v40  ;;  %v2416_v41 = vld [vmem:[#allocation2 + $0x248] sm:$0xff]  }
 0x400   :  { %2137 = vmatmul.mubr.bf16.vlgmr.msra.gmra.mxu1 %v538_v42  ;;  %v2417_v42 = vld [vmem:[#allocation2 + $0x240] sm:$0xff]  }
 0x401   :  { %2176 = vmatprep.mubr.msk.bf16.mxu1 %vm2492_vm0, %v2491_v0  ;;  %2161 = vmatpush3.bf16.msra.mxu1 %v2394_v45  ;;  %v2421_v45 = vld [vmem:[#allocation2 + $0x2a0] sm:$0xff]  }
 0x402   :  { %2162 = vmatprep.subr.bf16.mxu1 %v2491_v0 }
 0x405   :  { %2163 = vmatpush3.bf16.msra.mxu1 %v2395_v46  ;;  %v2422_v46 = vld [vmem:[#allocation2 + $0x298] sm:$0xff]  }
 0x406   :  { %2164 = vmatprep.subr.bf16.mxu1 %v2491_v0 }
 0x409   :  { %2165 = vmatpush3.bf16.msra.mxu1 %v2396_v47  ;;  %v2423_v47 = vld [vmem:[#allocation2 + $0x290] sm:$0xff]  }
 0x40a   :  { %2166 = vmatprep.subr.bf16.mxu1 %v2491_v0 }
 0x40d   :  { %2167 = vmatpush3.bf16.msra.mxu1 %v2397_v48  ;;  %v2664_v48 = vld [vmem:[%s2745_s2 + $0x8] sm:$0xff] }
 0x40e   :  { %2168 = vmatprep.subr.bf16.mxu1 %v2491_v0 }
 0x411   :  { %2169 = vmatpush3.bf16.msra.mxu1 %v2398_v49  ;;  %v895_v49 = vrot.slane %v2664_v48, %v36_v19  ;;  %v2426_v19 = vld [vmem:[#allocation2 + $0x2f8] sm:$0xff]  }
 0x412   :  { %2170 = vmatprep.subr.bf16.mxu1 %v2491_v0 }
 0x415   :  { %2171 = vmatpush3.bf16.msra.mxu1 %v2399_v50 }
 0x416   :  { %2172 = vmatprep.subr.bf16.mxu1 %v2491_v0 }
 0x419   :  { %2173 = vmatpush3.bf16.msra.mxu1 %v2400_v62  ;;  %v2427_v62 = vld [vmem:[#allocation2 + $0x2f0] sm:$0xff]  }
 0x41a   :  { %2174 = vmatprep.subr.bf16.mxu1 %v2491_v0 }
 0x41d   :  { %2175 = vmatpush3.bf16.msra.mxu1 %v2401_v63  ;;  %v2428_v63 = vld [vmem:[#allocation2 + $0x2e8] sm:$0xff]  }
 0x41e   :  { %2200 = vmatprep.subr.bf16.mxu1 %v2491_v0 }
 0x4c0   :  { %v642_v53 = vpop.f32.mrf.mxu1 }
 0x4c1   :  { %v643_v54 = vadd.f32 %v642_v53, %v559_v52 }
 0x4c2   :  { %v2138_v55 = vpop.f32.mrf.mxu1 }
 0x4c3   :  { %v648_v57 = vmul.f32 0.01, %v643_v54 }
 0x4c4   :  { %v645_v58 = vpop.f32.mrf.mxu1 }
 0x4c5   :  { %v649_v59 = vmax.f32 %v643_v54, %v648_v57 }
 0x4c6   :  { %v2139_v60 = vpop.f32.mrf.mxu1 }
 0x4c7   :  { %v650_v61 = vpack.c.bf16 %v649_v59, %v649_v59  ;;  %v2424_v60 = vld [vmem:[#allocation2 + $0x288] sm:$0xff]  }
 0x4c9   :  { %2157 = vmatmul.mubr.bf16.vlgmr.msra.gmra.mxu0 %v650_v61  ;;  %v2425_v61 = vld [vmem:[#allocation2 + $0x280] sm:$0xff]  }
 0x4ca   :  { %2196 = vmatprep.mubr.msk.bf16.mxu0 %vm2492_vm0, %v2491_v0  ;;  %2181 = vmatpush3.bf16.msra.mxu0 %v2402_v1  ;;  %v2429_v1 = vld [vmem:[#allocation2 + $0x2e0] sm:$0xff]  }
 0x4cb   :  { %2182 = vmatprep.subr.bf16.mxu0 %v2491_v0 }
 0x4ce   :  { %2183 = vmatpush3.bf16.msra.mxu0 %v2403_v2  ;;  %v2430_v2 = vld [vmem:[#allocation2 + $0x2d8] sm:$0xff]  }
 0x4cf   :  { %2184 = vmatprep.subr.bf16.mxu0 %v2491_v0 }
 0x4d2   :  { %2185 = vmatpush3.bf16.msra.mxu0 %v2404_v3  ;;  %v2431_v3 = vld [vmem:[#allocation2 + $0x2d0] sm:$0xff]  }
 0x4d3   :  { %2186 = vmatprep.subr.bf16.mxu0 %v2491_v0 }
 0x4d6   :  { %2187 = vmatpush3.bf16.msra.mxu0 %v2405_v4  ;;  %v1007_v4 = vrot.slane %v2664_v48, %v110_v38  ;;  %v2434_v38 = vld [vmem:[#allocation2 + $0x338] sm:$0xff]  }
 0x4d7   :  { %2188 = vmatprep.subr.bf16.mxu0 %v2491_v0 }
 0x4da   :  { %2189 = vmatpush3.bf16.msra.mxu0 %v2406_v5 }
 0x4db   :  { %2190 = vmatprep.subr.bf16.mxu0 %v2491_v0 }
 0x4de   :  { %2191 = vmatpush3.bf16.msra.mxu0 %v2407_v6 }
 0x4df   :  { %2192 = vmatprep.subr.bf16.mxu0 %v2491_v0 }
 0x4e2   :  { %2193 = vmatpush3.bf16.msra.mxu0 %v2408_v21  ;;  %v2436_v21 = vld [vmem:[#allocation2 + $0x328] sm:$0xff]  }
 0x4e3   :  { %2194 = vmatprep.subr.bf16.mxu0 %v2491_v0 }
 0x4e6   :  { %2195 = vmatpush3.bf16.msra.mxu0 %v2409_v22  ;;  %v2437_v22 = vld [vmem:[#allocation2 + $0x320] sm:$0xff]  }
 0x4e7   :  { %2220 = vmatprep.subr.bf16.mxu0 %v2491_v0 }
 0x589   :  { %v754_v9 = vpop.f32.mrf.mxu0 }
 0x58a   :  { %v755_v10 = vadd.f32 %v754_v9, %v671_v8 }
 0x58b   :  { %v2158_v12 = vpop.f32.mrf.mxu0 }
 0x58c   :  { %v760_v13 = vmul.f32 0.01, %v755_v10 }
 0x58d   :  { %v757_v14 = vpop.f32.mrf.mxu0 }
 0x58e   :  { %v761_v15 = vmax.f32 %v755_v10, %v760_v13 }
 0x58f   :  { %v2159_v16 = vpop.f32.mrf.mxu0 }
 0x590   :  { %v762_v17 = vpack.c.bf16 %v761_v15, %v761_v15  ;;  %v2432_v15 = vld [vmem:[#allocation2 + $0x2c8] sm:$0xff]   ;;  %v2433_v16 = vld [vmem:[#allocation2 + $0x2c0] sm:$0xff]  }
 0x592   :  { %2177 = vmatmul.mubr.bf16.vlgmr.msra.gmra.mxu1 %v762_v17  ;;  %v2435_v17 = vld [vmem:[#allocation2 + $0x330] sm:$0xff]  }
 0x593   :  { %2216 = vmatprep.mubr.msk.bf16.mxu1 %vm2492_vm0, %v2491_v0  ;;  %2201 = vmatpush3.bf16.msra.mxu1 %v2410_v23  ;;  %v2438_v23 = vld [vmem:[#allocation2 + $0x318] sm:$0xff]  }
 0x594   :  { %2202 = vmatprep.subr.bf16.mxu1 %v2491_v0 }
 0x597   :  { %2203 = vmatpush3.bf16.msra.mxu1 %v2411_v24  ;;  %v2439_v24 = vld [vmem:[#allocation2 + $0x310] sm:$0xff]  }
 0x598   :  { %2204 = vmatprep.subr.bf16.mxu1 %v2491_v0 }
 0x59b   :  { %2205 = vmatpush3.bf16.msra.mxu1 %v2412_v25  ;;  %v1119_v25 = vrot.slane %v2664_v48, %v222_v56  ;;  %v2442_v56 = vld [vmem:[#allocation2 + $0x378] sm:$0xff]  }
 0x59c   :  { %2206 = vmatprep.subr.bf16.mxu1 %v2491_v0 }
 0x59f   :  { %2207 = vmatpush3.bf16.msra.mxu1 %v2413_v26 }
 0x5a0   :  { %2208 = vmatprep.subr.bf16.mxu1 %v2491_v0 }
 0x5a3   :  { %2209 = vmatpush3.bf16.msra.mxu1 %v2414_v27 }
 0x5a4   :  { %2210 = vmatprep.subr.bf16.mxu1 %v2491_v0 }
 0x5a7   :  { %2211 = vmatpush3.bf16.msra.mxu1 %v2415_v28 }
 0x5a8   :  { %2212 = vmatprep.subr.bf16.mxu1 %v2491_v0 }
 0x5ab   :  { %2213 = vmatpush3.bf16.msra.mxu1 %v2416_v41  ;;  %v2445_v41 = vld [vmem:[#allocation2 + $0x360] sm:$0xff]  }
 0x5ac   :  { %2214 = vmatprep.subr.bf16.mxu1 %v2491_v0 }
 0x5af   :  { %2215 = vmatpush3.bf16.msra.mxu1 %v2417_v42  ;;  %v2446_v42 = vld [vmem:[#allocation2 + $0x358] sm:$0xff]  }
 0x5b0   :  { %2240 = vmatprep.subr.bf16.mxu1 %v2491_v0 }
 0x652   :  { %v866_v31 = vpop.f32.mrf.mxu1 }
 0x653   :  { %v867_v33 = vadd.f32 %v866_v31, %v783_v30 }
 0x654   :  { %v2178_v34 = vpop.f32.mrf.mxu1 }
 0x655   :  { %v872_v35 = vmul.f32 0.01, %v867_v33 }
 0x656   :  { %v869_v36 = vpop.f32.mrf.mxu1 }
 0x657   :  { %v873_v37 = vmax.f32 %v867_v33, %v872_v35  ;;  %v2440_v36 = vld [vmem:[#allocation2 + $0x308] sm:$0xff]  }
 0x658   :  { %v2179_v39 = vpop.f32.mrf.mxu1 }
 0x659   :  { %v874_v40 = vpack.c.bf16 %v873_v37, %v873_v37  ;;  %v2441_v37 = vld [vmem:[#allocation2 + $0x300] sm:$0xff]   ;;  %v2443_v39 = vld [vmem:[#allocation2 + $0x370] sm:$0xff]  }
 0x65b   :  { %2197 = vmatmul.mubr.bf16.vlgmr.msra.gmra.mxu0 %v874_v40  ;;  %v2444_v40 = vld [vmem:[#allocation2 + $0x368] sm:$0xff]  }
 0x65c   :  { %2236 = vmatprep.mubr.msk.bf16.mxu0 %vm2492_vm0, %v2491_v0  ;;  %2221 = vmatpush3.bf16.msra.mxu0 %v2418_v20  ;;  %v2447_v20 = vld [vmem:[#allocation2 + $0x350] sm:$0xff]  }
 0x65d   :  { %2222 = vmatprep.subr.bf16.mxu0 %v2491_v0 }
 0x660   :  { %2223 = vmatpush3.bf16.msra.mxu0 %v2419_v43  ;;  %v1231_v43 = vrot.slane %v2664_v48, %v334_v11  ;;  %v2450_v11 = vld [vmem:[#allocation2 + $0x3b8] sm:$0xff]  }
 0x661   :  { %2224 = vmatprep.subr.bf16.mxu0 %v2491_v0 }
 0x664   :  { %2225 = vmatpush3.bf16.msra.mxu0 %v2420_v44 }
 0x665   :  { %2226 = vmatprep.subr.bf16.mxu0 %v2491_v0 }
 0x668   :  { %2227 = vmatpush3.bf16.msra.mxu0 %v2421_v45 }
 0x669   :  { %2228 = vmatprep.subr.bf16.mxu0 %v2491_v0 }
 0x66c   :  { %2229 = vmatpush3.bf16.msra.mxu0 %v2422_v46 }
 0x66d   :  { %2230 = vmatprep.subr.bf16.mxu0 %v2491_v0 }
 0x670   :  { %2231 = vmatpush3.bf16.msra.mxu0 %v2423_v47 }
 0x671   :  { %2232 = vmatprep.subr.bf16.mxu0 %v2491_v0 }
 0x674   :  { %2233 = vmatpush3.bf16.msra.mxu0 %v2424_v60  ;;  %v2454_v60 = vld [vmem:[#allocation2 + $0x398] sm:$0xff]  }
 0x675   :  { %2234 = vmatprep.subr.bf16.mxu0 %v2491_v0 }
 0x678   :  { %2235 = vmatpush3.bf16.msra.mxu0 %v2425_v61  ;;  %v2455_v61 = vld [vmem:[#allocation2 + $0x390] sm:$0xff]  }
 0x679   :  { %2260 = vmatprep.subr.bf16.mxu0 %v2491_v0 }
 0x71b   :  { %v978_v50 = vpop.f32.mrf.mxu0 }
 0x71c   :  { %v979_v52 = vadd.f32 %v978_v50, %v895_v49 }
 0x71d   :  { %v2198_v53 = vpop.f32.mrf.mxu0 }
 0x71e   :  { %v984_v54 = vmul.f32 0.01, %v979_v52 }
 0x71f   :  { %v981_v55 = vpop.f32.mrf.mxu0 }
 0x720   :  { %v985_v57 = vmax.f32 %v979_v52, %v984_v54  ;;  %v2448_v54 = vld [vmem:[#allocation2 + $0x348] sm:$0xff]   ;;  %v2449_v55 = vld [vmem:[#allocation2 + $0x340] sm:$0xff]  }
 0x721   :  { %v2199_v58 = vpop.f32.mrf.mxu0 }
 0x722   :  { %v986_v59 = vpack.c.bf16 %v985_v57, %v985_v57  ;;  %v2451_v57 = vld [vmem:[#allocation2 + $0x3b0] sm:$0xff]   ;;  %v2452_v58 = vld [vmem:[#allocation2 + $0x3a8] sm:$0xff]  }
 0x724   :  { %2217 = vmatmul.mubr.bf16.vlgmr.msra.gmra.mxu1 %v986_v59  ;;  %v2453_v59 = vld [vmem:[#allocation2 + $0x3a0] sm:$0xff]  }
 0x725   :  { %2256 = vmatprep.mubr.msk.bf16.mxu1 %vm2492_vm0, %v2491_v0  ;;  %2241 = vmatpush3.bf16.msra.mxu1 %v2426_v19  ;;  %v1343_v19 = vrot.slane %v2664_v48, %v446_v32  ;;  %v2459_v32 = vld [vmem:[#allocation2 + $0x3f0] sm:$0xff]  }
 0x726   :  { %2242 = vmatprep.subr.bf16.mxu1 %v2491_v0 }
 0x729   :  { %2243 = vmatpush3.bf16.msra.mxu1 %v2427_v62 }
 0x72a   :  { %2244 = vmatprep.subr.bf16.mxu1 %v2491_v0 }
 0x72d   :  { %2245 = vmatpush3.bf16.msra.mxu1 %v2428_v63 }
 0x72e   :  { %2246 = vmatprep.subr.bf16.mxu1 %v2491_v0 }
 0x731   :  { %2247 = vmatpush3.bf16.msra.mxu1 %v2429_v1 }
 0x732   :  { %2248 = vmatprep.subr.bf16.mxu1 %v2491_v0 }
 0x735   :  { %2249 = vmatpush3.bf16.msra.mxu1 %v2430_v2 }
 0x736   :  { %2250 = vmatprep.subr.bf16.mxu1 %v2491_v0 }
 0x739   :  { %2251 = vmatpush3.bf16.msra.mxu1 %v2431_v3 }
 0x73a   :  { %2252 = vmatprep.subr.bf16.mxu1 %v2491_v0 }
 0x73d   :  { %2253 = vmatpush3.bf16.msra.mxu1 %v2432_v15  ;;  %v2463_v15 = vld [vmem:[#allocation2 + $0x3d0] sm:$0xff]  }
 0x73e   :  { %2254 = vmatprep.subr.bf16.mxu1 %v2491_v0 }
 0x741   :  { %2255 = vmatpush3.bf16.msra.mxu1 %v2433_v16  ;;  %v1455_v16 = vrot.slane %v2664_v48, %v558_v51 }
 0x742   :  { %2280 = vmatprep.subr.bf16.mxu1 %v2491_v0 }
 0x7e4   :  { %v1090_v5 = vpop.f32.mrf.mxu1 }
 0x7e5   :  { %v1091_v6 = vadd.f32 %v1090_v5, %v1007_v4 }
 0x7e6   :  { %v2218_v8 = vpop.f32.mrf.mxu1 }
 0x7e7   :  { %v1096_v9 = vmul.f32 0.01, %v1091_v6  ;;  %v2456_v8 = vld [vmem:[#allocation2 + $0x388] sm:$0xff]  }
 0x7e8   :  { %v1093_v10 = vpop.f32.mrf.mxu1 }
 0x7e9   :  { %v1097_v12 = vmax.f32 %v1091_v6, %v1096_v9  ;;  %v2457_v9 = vld [vmem:[#allocation2 + $0x380] sm:$0xff]   ;;  %v2458_v10 = vld [vmem:[#allocation2 + $0x3f8] sm:$0xff]  }
 0x7ea   :  { %v2219_v13 = vpop.f32.mrf.mxu1 }
 0x7eb   :  { %v1098_v14 = vpack.c.bf16 %v1097_v12, %v1097_v12  ;;  %v2460_v12 = vld [vmem:[#allocation2 + $0x3e8] sm:$0xff]   ;;  %v2461_v13 = vld [vmem:[#allocation2 + $0x3e0] sm:$0xff]  }
 0x7ed   :  { %2237 = vmatmul.mubr.bf16.vlgmr.msra.gmra.mxu0 %v1098_v14  ;;  %v2462_v14 = vld [vmem:[#allocation2 + $0x3d8] sm:$0xff]  }
 0x7ee   :  { %2276 = vmatprep.mubr.msk.bf16.mxu0 %vm2492_vm0, %v2491_v0  ;;  %2261 = vmatpush3.bf16.msra.mxu0 %v2434_v38 }
 0x7ef   :  { %2262 = vmatprep.subr.bf16.mxu0 %v2491_v0 }
 0x7f2   :  { %2263 = vmatpush3.bf16.msra.mxu0 %v2435_v17 }
 0x7f3   :  { %2264 = vmatprep.subr.bf16.mxu0 %v2491_v0 }
 0x7f6   :  { %2265 = vmatpush3.bf16.msra.mxu0 %v2436_v21 }
 0x7f7   :  { %2266 = vmatprep.subr.bf16.mxu0 %v2491_v0 }
 0x7fa   :  { %2267 = vmatpush3.bf16.msra.mxu0 %v2437_v22 }
 0x7fb   :  { %2268 = vmatprep.subr.bf16.mxu0 %v2491_v0 }
 0x7fe   :  { %2269 = vmatpush3.bf16.msra.mxu0 %v2438_v23 }
 0x7ff   :  { %2270 = vmatprep.subr.bf16.mxu0 %v2491_v0 }
 0x802   :  { %2271 = vmatpush3.bf16.msra.mxu0 %v2439_v24 }
 0x803   :  { %2272 = vmatprep.subr.bf16.mxu0 %v2491_v0 }
 0x806   :  { %2273 = vmatpush3.bf16.msra.mxu0 %v2440_v36 }
 0x807   :  { %2274 = vmatprep.subr.bf16.mxu0 %v2491_v0 }
 0x80a   :  { %2275 = vmatpush3.bf16.msra.mxu0 %v2441_v37 }
 0x80b   :  { %2300 = vmatprep.subr.bf16.mxu0 %v2491_v0 }
 0x8ad   :  { %v1202_v26 = vpop.f32.mrf.mxu0 }
 0x8ae   :  { %v1203_v27 = vadd.f32 %v1202_v26, %v1119_v25 }
 0x8af   :  { %v2238_v28 = vpop.f32.mrf.mxu0 }
 0x8b0   :  { %v1208_v30 = vmul.f32 0.01, %v1203_v27  ;;  %v2465_v28 = vld [vmem:[#allocation2 + $0x3c0] sm:$0xff]  }
 0x8b1   :  { %v1205_v31 = vpop.f32.mrf.mxu0 }
 0x8b2   :  { %v1209_v33 = vmax.f32 %v1203_v27, %v1208_v30  ;;  %v2464_v27 = vld [vmem:[#allocation2 + $0x3c8] sm:$0xff]   ;;  %v1567_v30 = vrot.slane %v2664_v48, %v670_v7 }
 0x8b3   :  { %v2239_v34 = vpop.f32.mrf.mxu0 }
 0x8b4   :  { %v1210_v35 = vpack.c.bf16 %v1209_v33, %v1209_v33 }
 0x8b6   :  { %2257 = vmatmul.mubr.bf16.vlgmr.msra.gmra.mxu1 %v1210_v35 }
 0x8b7   :  { %2296 = vmatprep.mubr.msk.bf16.mxu1 %vm2492_vm0, %v2491_v0  ;;  %2281 = vmatpush3.bf16.msra.mxu1 %v2442_v56 }
 0x8b8   :  { %2282 = vmatprep.subr.bf16.mxu1 %v2491_v0 }
 0x8bb   :  { %2283 = vmatpush3.bf16.msra.mxu1 %v2443_v39  ;;  %v1679_v39 = vrot.slane %v2664_v48, %v782_v29 }
 0x8bc   :  { %2284 = vmatprep.subr.bf16.mxu1 %v2491_v0 }
 0x8bf   :  { %2285 = vmatpush3.bf16.msra.mxu1 %v2444_v40 }
 0x8c0   :  { %2286 = vmatprep.subr.bf16.mxu1 %v2491_v0 }
 0x8c3   :  { %2287 = vmatpush3.bf16.msra.mxu1 %v2445_v41 }
 0x8c4   :  { %2288 = vmatprep.subr.bf16.mxu1 %v2491_v0 }
 0x8c7   :  { %2289 = vmatpush3.bf16.msra.mxu1 %v2446_v42 }
 0x8c8   :  { %2290 = vmatprep.subr.bf16.mxu1 %v2491_v0 }
 0x8cb   :  { %2291 = vmatpush3.bf16.msra.mxu1 %v2447_v20 }
 0x8cc   :  { %2292 = vmatprep.subr.bf16.mxu1 %v2491_v0 }
 0x8cf   :  { %2293 = vmatpush3.bf16.msra.mxu1 %v2448_v54 }
 0x8d0   :  { %2294 = vmatprep.subr.bf16.mxu1 %v2491_v0 }
 0x8d3   :  { %2295 = vmatpush3.bf16.msra.mxu1 %v2449_v55 }
 0x8d4   :  { %2320 = vmatprep.subr.bf16.mxu1 %v2491_v0 }
 0x976   :  { %v1314_v44 = vpop.f32.mrf.mxu1 }
 0x977   :  { %v1315_v45 = vadd.f32 %v1314_v44, %v1231_v43 }
 0x978   :  { %v2258_v46 = vpop.f32.mrf.mxu1 }
 0x979   :  { %v1320_v47 = vmul.f32 0.01, %v1315_v45 }
 0x97a   :  { %v1317_v49 = vpop.f32.mrf.mxu1 }
 0x97b   :  { %v1321_v50 = vmax.f32 %v1315_v45, %v1320_v47 }
 0x97c   :  { %v2259_v52 = vpop.f32.mrf.mxu1 }
 0x97d   :  { %v1322_v53 = vpack.c.bf16 %v1321_v50, %v1321_v50 }
 0x97f   :  { %2277 = vmatmul.mubr.bf16.vlgmr.msra.gmra.mxu0 %v1322_v53 }
 0x980   :  { %2316 = vmatprep.mubr.msk.bf16.mxu0 %vm2492_vm0, %v2491_v0  ;;  %2301 = vmatpush3.bf16.msra.mxu0 %v2450_v11 }
 0x981   :  { %2302 = vmatprep.subr.bf16.mxu0 %v2491_v0 }
 0x984   :  { %2303 = vmatpush3.bf16.msra.mxu0 %v2451_v57 }
 0x985   :  { %2304 = vmatprep.subr.bf16.mxu0 %v2491_v0 }
 0x988   :  { %2305 = vmatpush3.bf16.msra.mxu0 %v2452_v58 }
 0x989   :  { %2306 = vmatprep.subr.bf16.mxu0 %v2491_v0 }
 0x98c   :  { %2307 = vmatpush3.bf16.msra.mxu0 %v2453_v59 }
 0x98d   :  { %2308 = vmatprep.subr.bf16.mxu0 %v2491_v0 }
 0x990   :  { %2309 = vmatpush3.bf16.msra.mxu0 %v2454_v60 }
 0x991   :  { %2310 = vmatprep.subr.bf16.mxu0 %v2491_v0 }
 0x994   :  { %2311 = vmatpush3.bf16.msra.mxu0 %v2455_v61 }
 0x995   :  { %2312 = vmatprep.subr.bf16.mxu0 %v2491_v0 }
 0x998   :  { %2313 = vmatpush3.bf16.msra.mxu0 %v2456_v8 }
 0x999   :  { %2314 = vmatprep.subr.bf16.mxu0 %v2491_v0 }
 0x99c   :  { %2315 = vmatpush3.bf16.msra.mxu0 %v2457_v9 }
 0xa3f   :  { %v1426_v62 = vpop.f32.mrf.mxu0 }
 0xa40   :  { %v1427_v63 = vadd.f32 %v1426_v62, %v1343_v19 }
 0xa41   :  { %v2278_v1 = vpop.f32.mrf.mxu0 }
 0xa42   :  { %v1432_v2 = vmul.f32 0.01, %v1427_v63 }
 0xa43   :  { %v1429_v3 = vpop.f32.mrf.mxu0 }
 0xa44   :  { %v1433_v4 = vmax.f32 %v1427_v63, %v1432_v2 }
 0xa45   :  { %v2279_v5 = vpop.f32.mrf.mxu0 }
 0xa46   :  { %v1434_v6 = vpack.c.bf16 %v1433_v4, %v1433_v4 }
 0xa48   :  { %2297 = vmatmul.mubr.bf16.vlgmr.msra.gmra.mxu1 %v1434_v6 }
 0xa49   :  { %2336 = vmatprep.mubr.msk.bf16.mxu1 %vm2492_vm0, %v2491_v0  ;;  %2321 = vmatpush3.bf16.msra.mxu1 %v2458_v10 }
 0xa4a   :  { %2322 = vmatprep.subr.bf16.mxu1 %v2491_v0 }
 0xa4d   :  { %2323 = vmatpush3.bf16.msra.mxu1 %v2459_v32 }
 0xa4e   :  { %2324 = vmatprep.subr.bf16.mxu1 %v2491_v0 }
 0xa51   :  { %2325 = vmatpush3.bf16.msra.mxu1 %v2460_v12 }
 0xa52   :  { %2326 = vmatprep.subr.bf16.mxu1 %v2491_v0 }
 0xa55   :  { %2327 = vmatpush3.bf16.msra.mxu1 %v2461_v13 }
 0xa56   :  { %2328 = vmatprep.subr.bf16.mxu1 %v2491_v0 }
 0xa59   :  { %2329 = vmatpush3.bf16.msra.mxu1 %v2462_v14 }
 0xa5a   :  { %2330 = vmatprep.subr.bf16.mxu1 %v2491_v0 }
 0xa5d   :  { %2331 = vmatpush3.bf16.msra.mxu1 %v2463_v15 }
 0xa5e   :  { %2332 = vmatprep.subr.bf16.mxu1 %v2491_v0 }
 0xa61   :  { %2333 = vmatpush3.bf16.msra.mxu1 %v2464_v27 }
 0xa62   :  { %2334 = vmatprep.subr.bf16.mxu1 %v2491_v0 }
 0xa65   :  { %2335 = vmatpush3.bf16.msra.mxu1 %v2465_v28 }
 0xb08   :  { %v1538_v38 = vpop.f32.mrf.mxu1 }
 0xb09   :  { %v1539_v17 = vadd.f32 %v1538_v38, %v1455_v16 }
 0xb0a   :  { %v2298_v21 = vpop.f32.mrf.mxu1 }
 0xb0b   :  { %v1544_v22 = vmul.f32 0.01, %v1539_v17 }
 0xb0c   :  { %v1541_v23 = vpop.f32.mrf.mxu1 }
 0xb0d   :  { %v1545_v24 = vmax.f32 %v1539_v17, %v1544_v22 }
 0xb0e   :  { %v2299_v25 = vpop.f32.mrf.mxu1 }
 0xb0f   :  { %v1546_v26 = vpack.c.bf16 %v1545_v24, %v1545_v24 }
 0xb11   :  { %2317 = vmatmul.mubr.bf16.vlgmr.msra.gmra.mxu0 %v1546_v26 }
 0xbd1   :  { %v1650_v51 = vpop.f32.mrf.mxu0 }
 0xbd2   :  { %v1651_v31 = vadd.f32 %v1650_v51, %v1567_v30 }
 0xbd3   :  { %v2318_v33 = vpop.f32.mrf.mxu0 }
 0xbd4   :  { %v1656_v34 = vmul.f32 0.01, %v1651_v31 }
 0xbd5   :  { %v1653_v35 = vpop.f32.mrf.mxu0 }
 0xbd6   :  { %v1657_v36 = vmax.f32 %v1651_v31, %v1656_v34 }
 0xbd7   :  { %v2319_v37 = vpop.f32.mrf.mxu0 }
 0xbd8   :  { %v1658_v56 = vpack.c.bf16 %v1657_v36, %v1657_v36 }
 0xbda   :  { %2337 = vmatmul.mubr.bf16.vlgmr.msra.gmra.mxu1 %v1658_v56 }
 0xc9a   :  { %v1762_v0 = vpop.f32.mrf.mxu1 }
 0xc9b   :  { %v1763_v40 = vadd.f32 %v1762_v0, %v1679_v39 }
 0xc9c   :  { %v2338_v41 = vpop.f32.mrf.mxu1 }
 0xc9d   :  { %1769 = vst.msk [vmem:[%s2746_s3] sm:$0xff] %vm1768_vm2, %v1763_v40 }
 0xc9e   :  { %v1765_v7 = vpop.f32.mrf.mxu1 }
 0xca0   :  { %v2339_v42 = vpop.f32.mrf.mxu1 }
 0xca1   :  { %1774 = vsyncpa [#allocation3], 1 }

</bundles_post_ra>
